<compile_context>
chip_gen: v5e
topology: v5e:2x2
jax: 0.10.0
libtpu: 0.0.40
codegen_flags: <defaults>
</compile_context>

<pallas_src>
import functools
import math

import jax
import jax.numpy as jnp
from jax import lax
from jax.experimental import pallas as pl
from jax.experimental.pallas import tpu as pltpu

LN_EPS = 1e-5
_SQRT_HALF = 0.7071067811865476


def _layer_norm(y, gamma, beta):
    # Single-pass mean / variance: one sum + one sum-of-squares reduction
    # (kept in f32 for numerical safety even when GEMM operands are bf16).
    d = y.shape[-1]
    s1 = jnp.sum(y, axis=-1, keepdims=True)
    s2 = jnp.sum(y * y, axis=-1, keepdims=True)
    mean = s1 * (1.0 / d)
    var = s2 * (1.0 / d) - mean * mean
    inv = lax.rsqrt(var + LN_EPS)
    return (y - mean) * inv * gamma + beta


def _erf(x):
    # Abramowitz & Stegun 7.1.26 rational approximation (|err| < 1.5e-7),
    # built from exp / mul / add + approximate reciprocal (EUP slot).
    a1, a2, a3, a4, a5 = (0.254829592, -0.284496736, 1.421413741,
                          -1.453152027, 1.061405429)
    p = 0.3275911
    sgn = jnp.where(x >= 0, 1.0, -1.0)
    ax = jnp.abs(x)
    t = pl.reciprocal(1.0 + p * ax, approx=True)
    poly = ((((a5 * t + a4) * t + a3) * t + a2) * t + a1) * t
    return sgn * (1.0 - poly * jnp.exp(-ax * ax))


def encoder_block_kernel(x_ref, wqkv_ref, bqkv_ref, wo_ref, bo_ref,
                         g1_ref, b1_ref, w1_ref, bm1_ref, w2_ref, bm2_ref,
                         g2_ref, b2_ref, o_ref, heads_ref, *, num_heads, d_k):
    # x_ref: (1, S, D)   wqkv: (D, 3D)  bqkv: (1, 3D)   wo: (D, D)
    # w1: (D, Dh)  bm1: (1, Dh)  w2: (Dh, D)  bo/bm2/g*/b*: (1, D)
    # heads_ref: (S, D) f32 VMEM scratch.  GEMM operand dtype = weight dtype.
    gd = wqkv_ref.dtype
    x = x_ref[0].astype(jnp.float32)                      # (S, D) f32 (residuals/LN)
    S, D = x.shape
    scale = 1.0 / math.sqrt(d_k)

    # ---- fused QKV projection: one lane-dense (S,D)@(D,3D) MXU dot -------
    qkv = jnp.dot(x.astype(gd), wqkv_ref[...],
                  preferred_element_type=jnp.float32) + bqkv_ref[...]   # (S, 3D)

    # ---- per-head softmax attention; head outputs assembled in scratch ---
    for h in range(num_heads):                            # static unroll
        lo = h * d_k
        qh = qkv[:, lo:lo + d_k]
        kh = qkv[:, D + lo:D + lo + d_k]
        vh = qkv[:, 2 * D + lo:2 * D + lo + d_k]
        s = lax.dot_general(qh.astype(gd), kh.astype(gd),
                            (((1,), (1,)), ((), ())),
                            preferred_element_type=jnp.float32) * scale  # (S, S)
        s = s - jnp.max(s, axis=-1, keepdims=True)
        p = jnp.exp(s)
        p = p * pl.reciprocal(jnp.sum(p, axis=-1, keepdims=True), approx=True)
        heads_ref[:, lo:lo + d_k] = jnp.dot(p.astype(gd), vh.astype(gd),
                                            preferred_element_type=jnp.float32)

    # ---- single dense output projection (K = D, not K = d_k) -------------
    attn = jnp.dot(heads_ref[...].astype(gd), wo_ref[...],
                   preferred_element_type=jnp.float32) + bo_ref[...]

    x1 = _layer_norm(x + attn, g1_ref[...], b1_ref[...])  # residual + LN1 (f32)

    # ---- MLP: FC1 + exact-erf GELU + FC2, residual, LayerNorm2 -----------
    hdn = jnp.dot(x1.astype(gd), w1_ref[...],
                  preferred_element_type=jnp.float32) + bm1_ref[...]     # (S, Dh)
    hdn = 0.5 * hdn * (1.0 + _erf(hdn * _SQRT_HALF))
    y = jnp.dot(hdn.astype(gd), w2_ref[...],
                preferred_element_type=jnp.float32) + bm2_ref[...]

    o_ref[0] = _layer_norm(x1 + y, g2_ref[...], b2_ref[...]).astype(o_ref.dtype)
    # TODO(synk): Dropout layers (attention, dropout1/2, MLP) are identity
    # here (inference/eval semantics); stochastic dropout is not implemented.


def prepare_encoder_params(params, num_heads, gemm_dtype=jnp.bfloat16):
    """One-time weight layout / dtype prep (hoisted out of the per-call path).

    PyTorch Linear stores W as (out, in); the kernel wants (in, out). QKV is
    packed into a single (D, 3D) matrix so the projection is one dense GEMM.
    GEMM weights are stored in `gemm_dtype` (bf16 by default, MXU-native);
    biases / LN params stay f32.
    """
    f32 = jnp.float32
    D = params["wq"].shape[1]
    Dh = params["fc1_w"].shape[0]
    wqkv = jnp.concatenate(
        [jnp.transpose(params["wq"]), jnp.transpose(params["wk"]),
         jnp.transpose(params["wv"])], axis=1).astype(gemm_dtype)        # (D, 3D)
    bqkv = jnp.concatenate(
        [params["bq"], params["bk"], params["bv"]]).astype(f32).reshape(1, 3 * D)
    return dict(
        num_heads=num_heads,
        wqkv=wqkv, bqkv=bqkv,
        wo=jnp.transpose(params["wo"]).astype(gemm_dtype),               # (D, D)
        bo=params["bo"].astype(f32).reshape(1, D),
        g1=params["ln1_g"].astype(f32).reshape(1, D),
        b1=params["ln1_b"].astype(f32).reshape(1, D),
        w1=jnp.transpose(params["fc1_w"]).astype(gemm_dtype),            # (D, Dh)
        bm1=params["fc1_b"].astype(f32).reshape(1, Dh),
        w2=jnp.transpose(params["fc2_w"]).astype(gemm_dtype),            # (Dh, D)
        bm2=params["fc2_b"].astype(f32).reshape(1, D),
        g2=params["ln2_g"].astype(f32).reshape(1, D),
        b2=params["ln2_b"].astype(f32).reshape(1, D),
    )


def transformer_encoder(x, prep):
    """x: (B, S, D). prep: output of prepare_encoder_params. Returns (B, S, D)."""
    B, S, D = x.shape
    H = prep["num_heads"]
    dk = D // H
    Dh = prep["w1"].shape[1]

    # Per-generation VMEM budget (~75% of physical) instead of a fixed 32 MiB.
    try:
        vmem_cap = pltpu.get_tpu_info().vmem_capacity_bytes
    except Exception:
        vmem_cap = 64 * 1024 * 1024
    vmem_limit = int(vmem_cap * 0.75)

    w_bytes = prep["wqkv"].dtype.itemsize
    cost = pl.CostEstimate(
        flops=int(B * (2 * S * D * (3 * D + D + 2 * Dh) + 4 * S * S * D)),
        transcendentals=int(B * (H * S * S + S * Dh + H * S + S)),
        bytes_accessed=int(2 * B * S * D * x.dtype.itemsize
                           + (4 * D * D + 2 * D * Dh) * w_bytes
                           + 4 * (3 * D + 6 * D + Dh)),
    )

    const2 = lambda b: (0, 0)
    fwd = pl.pallas_call(
        functools.partial(encoder_block_kernel, num_heads=H, d_k=dk),
        out_shape=jax.ShapeDtypeStruct((B, S, D), x.dtype),
        grid_spec=pltpu.PrefetchScalarGridSpec(
            num_scalar_prefetch=0,
            grid=(B,),
            in_specs=[
                pl.BlockSpec((1, S, D), lambda b: (b, 0, 0)),   # x
                pl.BlockSpec((D, 3 * D), const2),               # wqkv
                pl.BlockSpec((1, 3 * D), const2),               # bqkv
                pl.BlockSpec((D, D), const2),                   # wo
                pl.BlockSpec((1, D), const2),                   # bo
                pl.BlockSpec((1, D), const2),                   # ln1 gamma
                pl.BlockSpec((1, D), const2),                   # ln1 beta
                pl.BlockSpec((D, Dh), const2),                  # w1
                pl.BlockSpec((1, Dh), const2),                  # b1 (mlp)
                pl.BlockSpec((Dh, D), const2),                  # w2
                pl.BlockSpec((1, D), const2),                   # b2 (mlp)
                pl.BlockSpec((1, D), const2),                   # ln2 gamma
                pl.BlockSpec((1, D), const2),                   # ln2 beta
            ],
            out_specs=pl.BlockSpec((1, S, D), lambda b: (b, 0, 0)),
            scratch_shapes=[pltpu.VMEM((S, D), jnp.float32)],   # head assembly
        ),
        compiler_params=pltpu.CompilerParams(
            dimension_semantics=("parallel",),
            vmem_limit_bytes=vmem_limit,
        ),
        cost_estimate=cost,
    )
    return fwd(x, prep["wqkv"], prep["bqkv"], prep["wo"], prep["bo"],
               prep["g1"], prep["b1"], prep["w1"], prep["bm1"],
               prep["w2"], prep["bm2"], prep["g2"], prep["b2"])


def _reference(x, p, num_heads):
    # Pure-JAX f32 reference mirroring the PyTorch module in eval mode.
    B, S, D = x.shape
    dk = D // num_heads

    def lin(v, w, b):
        return v @ jnp.transpose(w) + b

    def ln(v, g, b):
        m = jnp.mean(v, -1, keepdims=True)
        va = jnp.mean((v - m) ** 2, -1, keepdims=True)
        return (v - m) / jnp.sqrt(va + LN_EPS) * g + b

    def heads(v):
        return v.reshape(B, S, num_heads, dk).transpose(0, 2, 1, 3)

    q = heads(lin(x, p["wq"], p["bq"]))
    k = heads(lin(x, p["wk"], p["bk"]))
    v = heads(lin(x, p["wv"], p["bv"]))
    s = (q @ jnp.swapaxes(k, -1, -2)) / math.sqrt(dk)
    a = jax.nn.softmax(s, axis=-1)
    o = (a @ v).transpose(0, 2, 1, 3).reshape(B, S, D)
    o = lin(o, p["wo"], p["bo"])
    x1 = ln(x + o, p["ln1_g"], p["ln1_b"])

    h = lin(x1, p["fc1_w"], p["fc1_b"])
    h = 0.5 * h * (1.0 + lax.erf(h * _SQRT_HALF))          # exact GELU
    y = lin(h, p["fc2_w"], p["fc2_b"])
    return ln(x1 + y, p["ln2_g"], p["ln2_b"])


if __name__ == "__main__":
    B, S, d_model, num_heads, r_mlp = 2, 8, 32, 4, 4
    Dh = d_model * r_mlp

    key = jax.random.PRNGKey(0)
    keys = jax.random.split(key, 16)

    def w(k, shape, scale=0.1):
        return scale * jax.random.normal(k, shape, dtype=jnp.float32)

    x = jax.random.normal(keys[0], (B, S, d_model), dtype=jnp.float32)
    params = {
        "wq": w(keys[1], (d_model, d_model)), "bq": w(keys[2], (d_model,)),
        "wk": w(keys[3], (d_model, d_model)), "bk": w(keys[4], (d_model,)),
        "wv": w(keys[5], (d_model, d_model)), "bv": w(keys[6], (d_model,)),
        "wo": w(keys[7], (d_model, d_model)), "bo": w(keys[8], (d_model,)),
        "ln1_g": 1.0 + w(keys[9], (d_model,), 0.05),
        "ln1_b": w(keys[10], (d_model,), 0.05),
        "fc1_w": w(keys[11], (Dh, d_model)), "fc1_b": w(keys[12], (Dh,)),
        "fc2_w": w(keys[13], (d_model, Dh)), "fc2_b": w(keys[14], (d_model,)),
        "ln2_g": 1.0 + w(keys[15], (d_model,), 0.05),
        "ln2_b": jnp.zeros((d_model,), dtype=jnp.float32),
    }

    ref = _reference(x, params, num_heads)

    # Production path: bf16 MXU operands, f32 accumulation / LN / softmax / GELU.
    prep_bf16 = prepare_encoder_params(params, num_heads, jnp.bfloat16)
    out = jax.block_until_ready(transformer_encoder(x, prep_bf16))
    assert out.shape == (B, S, d_model)
    assert jnp.allclose(out, ref, atol=2e-2, rtol=2e-2), (
        float(jnp.max(jnp.abs(out - ref))))

    # Full-f32 path validates the kernel math at tight tolerance.
    prep_f32 = prepare_encoder_params(params, num_heads, jnp.float32)
    out32 = jax.block_until_ready(transformer_encoder(x, prep_f32))
    assert jnp.allclose(out32, ref, atol=5e-3, rtol=5e-3), (
        float(jnp.max(jnp.abs(out32 - ref))))

    print("KERNEL_OK")
</pallas_src>

<mosaic_0001>
module attributes {stable_mosaic.version = 11 : i64} {
  func.func @encoder_block_kernel(%arg0: i32, %arg1: memref<1x8x32xf32, #tpu.memory_space<vmem>>, %arg2: memref<32x96xbf16, #tpu.memory_space<vmem>>, %arg3: memref<1x96xf32, #tpu.memory_space<vmem>>, %arg4: memref<32x32xbf16, #tpu.memory_space<vmem>>, %arg5: memref<1x32xf32, #tpu.memory_space<vmem>>, %arg6: memref<1x32xf32, #tpu.memory_space<vmem>>, %arg7: memref<1x32xf32, #tpu.memory_space<vmem>>, %arg8: memref<32x128xbf16, #tpu.memory_space<vmem>>, %arg9: memref<1x128xf32, #tpu.memory_space<vmem>>, %arg10: memref<128x32xbf16, #tpu.memory_space<vmem>>, %arg11: memref<1x32xf32, #tpu.memory_space<vmem>>, %arg12: memref<1x32xf32, #tpu.memory_space<vmem>>, %arg13: memref<1x32xf32, #tpu.memory_space<vmem>>, %arg14: memref<1x8x32xf32, #tpu.memory_space<vmem>>, %arg15: memref<8x32xf32, #tpu.memory_space<vmem>>) attributes {dimension_semantics = [#tpu.dimension_semantics<parallel>], iteration_bounds = array<i64: 2>, scalar_prefetch = 0 : i64, scratch_operands = 1 : i64, tpu.core_type = #tpu.core_type<tc>, window_params = [{transform_indices = @transform_0, window_bounds = array<i64: 1, 8, 32>}, {pipeline_mode = #tpu.pipeline_mode<synchronous>, transform_indices = @transform_1, window_bounds = array<i64: 32, 96>}, {pipeline_mode = #tpu.pipeline_mode<synchronous>, transform_indices = @transform_2, window_bounds = array<i64: 1, 96>}, {pipeline_mode = #tpu.pipeline_mode<synchronous>, transform_indices = @transform_3, window_bounds = array<i64: 32, 32>}, {pipeline_mode = #tpu.pipeline_mode<synchronous>, transform_indices = @transform_4, window_bounds = array<i64: 1, 32>}, {pipeline_mode = #tpu.pipeline_mode<synchronous>, transform_indices = @transform_5, window_bounds = array<i64: 1, 32>}, {pipeline_mode = #tpu.pipeline_mode<synchronous>, transform_indices = @transform_6, window_bounds = array<i64: 1, 32>}, {pipeline_mode = #tpu.pipeline_mode<synchronous>, transform_indices = @transform_7, window_bounds = array<i64: 32, 128>}, {pipeline_mode = #tpu.pipeline_mode<synchronous>, transform_indices = @transform_8, window_bounds = array<i64: 1, 128>}, {pipeline_mode = #tpu.pipeline_mode<synchronous>, transform_indices = @transform_9, window_bounds = array<i64: 128, 32>}, {pipeline_mode = #tpu.pipeline_mode<synchronous>, transform_indices = @transform_10, window_bounds = array<i64: 1, 32>}, {pipeline_mode = #tpu.pipeline_mode<synchronous>, transform_indices = @transform_11, window_bounds = array<i64: 1, 32>}, {pipeline_mode = #tpu.pipeline_mode<synchronous>, transform_indices = @transform_12, window_bounds = array<i64: 1, 32>}, {transform_indices = @transform_13, window_bounds = array<i64: 1, 8, 32>}]} {
    %c0 = arith.constant 0 : index
    %c0_0 = arith.constant 0 : index
    %c0_1 = arith.constant 0 : index
    %0 = vector.load %arg1[%c0, %c0_0, %c0_1] : memref<1x8x32xf32, #tpu.memory_space<vmem>>, vector<1x8x32xf32>
    %1 = vector.shape_cast %0 : vector<1x8x32xf32> to vector<8x32xf32>
    %2 = arith.truncf %1 : vector<8x32xf32> to vector<8x32xbf16>
    %c0_2 = arith.constant 0 : index
    %c0_3 = arith.constant 0 : index
    %3 = vector.load %arg2[%c0_2, %c0_3] : memref<32x96xbf16, #tpu.memory_space<vmem>>, vector<32x96xbf16>
    %cst = arith.constant dense<0.000000e+00> : vector<8x96xf32>
    %4 = tpu.matmul %2, %3, %cst {dimension_numbers = #tpu.dot_dimension_numbers<[1], [0], [0], [1], [0, 0, 1, 1], [], []>} : vector<8x32xbf16>, vector<32x96xbf16>, vector<8x96xf32> -> vector<8x96xf32>
    %c0_4 = arith.constant 0 : index
    %c0_5 = arith.constant 0 : index
    %5 = vector.load %arg3[%c0_4, %c0_5] : memref<1x96xf32, #tpu.memory_space<vmem>>, vector<1x96xf32>
    %6 = vector.broadcast %5 : vector<1x96xf32> to vector<8x96xf32>
    %7 = arith.addf %4, %6 : vector<8x96xf32>
    %8 = vector.extract_strided_slice %7 {offsets = [0, 0], sizes = [8, 8], strides = [1, 1]} : vector<8x96xf32> to vector<8x8xf32>
    %9 = vector.extract_strided_slice %7 {offsets = [0, 32], sizes = [8, 8], strides = [1, 1]} : vector<8x96xf32> to vector<8x8xf32>
    %10 = vector.extract_strided_slice %7 {offsets = [0, 64], sizes = [8, 8], strides = [1, 1]} : vector<8x96xf32> to vector<8x8xf32>
    %11 = arith.truncf %8 : vector<8x8xf32> to vector<8x8xbf16>
    %12 = arith.truncf %9 : vector<8x8xf32> to vector<8x8xbf16>
    %cst_6 = arith.constant dense<0.000000e+00> : vector<8x8xf32>
    %13 = tpu.matmul %11, %12, %cst_6 {dimension_numbers = #tpu.dot_dimension_numbers<[1], [1], [0], [0], [0, 0, 1, 0], [], []>} : vector<8x8xbf16>, vector<8x8xbf16>, vector<8x8xf32> -> vector<8x8xf32>
    %cst_7 = arith.constant 0.353553385 : f32
    %14 = vector.broadcast %cst_7 : f32 to vector<8x8xf32>
    %15 = arith.mulf %13, %14 : vector<8x8xf32>
    %cst_8 = arith.constant dense<0xFF800000> : vector<8xf32>
    %16 = vector.multi_reduction <maximumf>, %15, %cst_8 [1] : vector<8x8xf32> to vector<8xf32>
    %17 = vector.shape_cast %16 : vector<8xf32> to vector<8x1xf32>
    %18 = vector.broadcast %17 : vector<8x1xf32> to vector<8x8xf32>
    %19 = arith.subf %15, %18 : vector<8x8xf32>
    %20 = math.exp %19 : vector<8x8xf32>
    %cst_9 = arith.constant dense<0.000000e+00> : vector<8xf32>
    %21 = vector.multi_reduction <add>, %20, %cst_9 [1] : vector<8x8xf32> to vector<8xf32>
    %22 = vector.shape_cast %21 : vector<8xf32> to vector<8x1xf32>
    %23 = tpu.reciprocal %22 {approx = true} : vector<8x1xf32> -> vector<8x1xf32>
    %24 = vector.broadcast %23 : vector<8x1xf32> to vector<8x8xf32>
    %25 = arith.mulf %20, %24 : vector<8x8xf32>
    %26 = arith.truncf %25 : vector<8x8xf32> to vector<8x8xbf16>
    %27 = arith.truncf %10 : vector<8x8xf32> to vector<8x8xbf16>
    %cst_10 = arith.constant dense<0.000000e+00> : vector<8x8xf32>
    %28 = tpu.matmul %26, %27, %cst_10 {dimension_numbers = #tpu.dot_dimension_numbers<[1], [0], [0], [1], [0, 0, 1, 1], [], []>} : vector<8x8xbf16>, vector<8x8xbf16>, vector<8x8xf32> -> vector<8x8xf32>
    %c0_11 = arith.constant 0 : index
    %c0_12 = arith.constant 0 : index
    %29 = vector.load %arg15[%c0_11, %c0_12] : memref<8x32xf32, #tpu.memory_space<vmem>>, vector<8x8xf32>
    tpu.vector_store %arg15[%c0_11, %c0_12], %28 {strides = array<i32>} : memref<8x32xf32, #tpu.memory_space<vmem>>, vector<8x8xf32>,
    %30 = vector.extract_strided_slice %7 {offsets = [0, 8], sizes = [8, 8], strides = [1, 1]} : vector<8x96xf32> to vector<8x8xf32>
    %31 = vector.extract_strided_slice %7 {offsets = [0, 40], sizes = [8, 8], strides = [1, 1]} : vector<8x96xf32> to vector<8x8xf32>
    %32 = vector.extract_strided_slice %7 {offsets = [0, 72], sizes = [8, 8], strides = [1, 1]} : vector<8x96xf32> to vector<8x8xf32>
    %33 = arith.truncf %30 : vector<8x8xf32> to vector<8x8xbf16>
    %34 = arith.truncf %31 : vector<8x8xf32> to vector<8x8xbf16>
    %cst_13 = arith.constant dense<0.000000e+00> : vector<8x8xf32>
    %35 = tpu.matmul %33, %34, %cst_13 {dimension_numbers = #tpu.dot_dimension_numbers<[1], [1], [0], [0], [0, 0, 1, 0], [], []>} : vector<8x8xbf16>, vector<8x8xbf16>, vector<8x8xf32> -> vector<8x8xf32>
    %cst_14 = arith.constant 0.353553385 : f32
    %36 = vector.broadcast %cst_14 : f32 to vector<8x8xf32>
    %37 = arith.mulf %35, %36 : vector<8x8xf32>
    %cst_15 = arith.constant dense<0xFF800000> : vector<8xf32>
    %38 = vector.multi_reduction <maximumf>, %37, %cst_15 [1] : vector<8x8xf32> to vector<8xf32>
    %39 = vector.shape_cast %38 : vector<8xf32> to vector<8x1xf32>
    %40 = vector.broadcast %39 : vector<8x1xf32> to vector<8x8xf32>
    %41 = arith.subf %37, %40 : vector<8x8xf32>
    %42 = math.exp %41 : vector<8x8xf32>
    %cst_16 = arith.constant dense<0.000000e+00> : vector<8xf32>
    %43 = vector.multi_reduction <add>, %42, %cst_16 [1] : vector<8x8xf32> to vector<8xf32>
    %44 = vector.shape_cast %43 : vector<8xf32> to vector<8x1xf32>
    %45 = tpu.reciprocal %44 {approx = true} : vector<8x1xf32> -> vector<8x1xf32>
    %46 = vector.broadcast %45 : vector<8x1xf32> to vector<8x8xf32>
    %47 = arith.mulf %42, %46 : vector<8x8xf32>
    %48 = arith.truncf %47 : vector<8x8xf32> to vector<8x8xbf16>
    %49 = arith.truncf %32 : vector<8x8xf32> to vector<8x8xbf16>
    %cst_17 = arith.constant dense<0.000000e+00> : vector<8x8xf32>
    %50 = tpu.matmul %48, %49, %cst_17 {dimension_numbers = #tpu.dot_dimension_numbers<[1], [0], [0], [1], [0, 0, 1, 1], [], []>} : vector<8x8xbf16>, vector<8x8xbf16>, vector<8x8xf32> -> vector<8x8xf32>
    %c0_18 = arith.constant 0 : index
    %c8 = arith.constant 8 : index
    %51 = vector.load %arg15[%c0_18, %c8] : memref<8x32xf32, #tpu.memory_space<vmem>>, vector<8x8xf32>
    tpu.vector_store %arg15[%c0_18, %c8], %50 {strides = array<i32>} : memref<8x32xf32, #tpu.memory_space<vmem>>, vector<8x8xf32>,
    %52 = vector.extract_strided_slice %7 {offsets = [0, 16], sizes = [8, 8], strides = [1, 1]} : vector<8x96xf32> to vector<8x8xf32>
    %53 = vector.extract_strided_slice %7 {offsets = [0, 48], sizes = [8, 8], strides = [1, 1]} : vector<8x96xf32> to vector<8x8xf32>
    %54 = vector.extract_strided_slice %7 {offsets = [0, 80], sizes = [8, 8], strides = [1, 1]} : vector<8x96xf32> to vector<8x8xf32>
    %55 = arith.truncf %52 : vector<8x8xf32> to vector<8x8xbf16>
    %56 = arith.truncf %53 : vector<8x8xf32> to vector<8x8xbf16>
    %cst_19 = arith.constant dense<0.000000e+00> : vector<8x8xf32>
    %57 = tpu.matmul %55, %56, %cst_19 {dimension_numbers = #tpu.dot_dimension_numbers<[1], [1], [0], [0], [0, 0, 1, 0], [], []>} : vector<8x8xbf16>, vector<8x8xbf16>, vector<8x8xf32> -> vector<8x8xf32>
    %cst_20 = arith.constant 0.353553385 : f32
    %58 = vector.broadcast %cst_20 : f32 to vector<8x8xf32>
    %59 = arith.mulf %57, %58 : vector<8x8xf32>
    %cst_21 = arith.constant dense<0xFF800000> : vector<8xf32>
    %60 = vector.multi_reduction <maximumf>, %59, %cst_21 [1] : vector<8x8xf32> to vector<8xf32>
    %61 = vector.shape_cast %60 : vector<8xf32> to vector<8x1xf32>
    %62 = vector.broadcast %61 : vector<8x1xf32> to vector<8x8xf32>
    %63 = arith.subf %59, %62 : vector<8x8xf32>
    %64 = math.exp %63 : vector<8x8xf32>
    %cst_22 = arith.constant dense<0.000000e+00> : vector<8xf32>
    %65 = vector.multi_reduction <add>, %64, %cst_22 [1] : vector<8x8xf32> to vector<8xf32>
    %66 = vector.shape_cast %65 : vector<8xf32> to vector<8x1xf32>
    %67 = tpu.reciprocal %66 {approx = true} : vector<8x1xf32> -> vector<8x1xf32>
    %68 = vector.broadcast %67 : vector<8x1xf32> to vector<8x8xf32>
    %69 = arith.mulf %64, %68 : vector<8x8xf32>
    %70 = arith.truncf %69 : vector<8x8xf32> to vector<8x8xbf16>
    %71 = arith.truncf %54 : vector<8x8xf32> to vector<8x8xbf16>
    %cst_23 = arith.constant dense<0.000000e+00> : vector<8x8xf32>
    %72 = tpu.matmul %70, %71, %cst_23 {dimension_numbers = #tpu.dot_dimension_numbers<[1], [0], [0], [1], [0, 0, 1, 1], [], []>} : vector<8x8xbf16>, vector<8x8xbf16>, vector<8x8xf32> -> vector<8x8xf32>
    %c0_24 = arith.constant 0 : index
    %c16 = arith.constant 16 : index
    %73 = vector.load %arg15[%c0_24, %c16] : memref<8x32xf32, #tpu.memory_space<vmem>>, vector<8x8xf32>
    tpu.vector_store %arg15[%c0_24, %c16], %72 {strides = array<i32>} : memref<8x32xf32, #tpu.memory_space<vmem>>, vector<8x8xf32>,
    %74 = vector.extract_strided_slice %7 {offsets = [0, 24], sizes = [8, 8], strides = [1, 1]} : vector<8x96xf32> to vector<8x8xf32>
    %75 = vector.extract_strided_slice %7 {offsets = [0, 56], sizes = [8, 8], strides = [1, 1]} : vector<8x96xf32> to vector<8x8xf32>
    %76 = vector.extract_strided_slice %7 {offsets = [0, 88], sizes = [8, 8], strides = [1, 1]} : vector<8x96xf32> to vector<8x8xf32>
    %77 = arith.truncf %74 : vector<8x8xf32> to vector<8x8xbf16>
    %78 = arith.truncf %75 : vector<8x8xf32> to vector<8x8xbf16>
    %cst_25 = arith.constant dense<0.000000e+00> : vector<8x8xf32>
    %79 = tpu.matmul %77, %78, %cst_25 {dimension_numbers = #tpu.dot_dimension_numbers<[1], [1], [0], [0], [0, 0, 1, 0], [], []>} : vector<8x8xbf16>, vector<8x8xbf16>, vector<8x8xf32> -> vector<8x8xf32>
    %cst_26 = arith.constant 0.353553385 : f32
    %80 = vector.broadcast %cst_26 : f32 to vector<8x8xf32>
    %81 = arith.mulf %79, %80 : vector<8x8xf32>
    %cst_27 = arith.constant dense<0xFF800000> : vector<8xf32>
    %82 = vector.multi_reduction <maximumf>, %81, %cst_27 [1] : vector<8x8xf32> to vector<8xf32>
    %83 = vector.shape_cast %82 : vector<8xf32> to vector<8x1xf32>
    %84 = vector.broadcast %83 : vector<8x1xf32> to vector<8x8xf32>
    %85 = arith.subf %81, %84 : vector<8x8xf32>
    %86 = math.exp %85 : vector<8x8xf32>
    %cst_28 = arith.constant dense<0.000000e+00> : vector<8xf32>
    %87 = vector.multi_reduction <add>, %86, %cst_28 [1] : vector<8x8xf32> to vector<8xf32>
    %88 = vector.shape_cast %87 : vector<8xf32> to vector<8x1xf32>
    %89 = tpu.reciprocal %88 {approx = true} : vector<8x1xf32> -> vector<8x1xf32>
    %90 = vector.broadcast %89 : vector<8x1xf32> to vector<8x8xf32>
    %91 = arith.mulf %86, %90 : vector<8x8xf32>
    %92 = arith.truncf %91 : vector<8x8xf32> to vector<8x8xbf16>
    %93 = arith.truncf %76 : vector<8x8xf32> to vector<8x8xbf16>
    %cst_29 = arith.constant dense<0.000000e+00> : vector<8x8xf32>
    %94 = tpu.matmul %92, %93, %cst_29 {dimension_numbers = #tpu.dot_dimension_numbers<[1], [0], [0], [1], [0, 0, 1, 1], [], []>} : vector<8x8xbf16>, vector<8x8xbf16>, vector<8x8xf32> -> vector<8x8xf32>
    %c0_30 = arith.constant 0 : index
    %c24 = arith.constant 24 : index
    %95 = vector.load %arg15[%c0_30, %c24] : memref<8x32xf32, #tpu.memory_space<vmem>>, vector<8x8xf32>
    tpu.vector_store %arg15[%c0_30, %c24], %94 {strides = array<i32>} : memref<8x32xf32, #tpu.memory_space<vmem>>, vector<8x8xf32>,
    %c0_31 = arith.constant 0 : index
    %c0_32 = arith.constant 0 : index
    %96 = vector.load %arg15[%c0_31, %c0_32] : memref<8x32xf32, #tpu.memory_space<vmem>>, vector<8x32xf32>
    %97 = arith.truncf %96 : vector<8x32xf32> to vector<8x32xbf16>
    %c0_33 = arith.constant 0 : index
    %c0_34 = arith.constant 0 : index
    %98 = vector.load %arg4[%c0_33, %c0_34] : memref<32x32xbf16, #tpu.memory_space<vmem>>, vector<32x32xbf16>
    %cst_35 = arith.constant dense<0.000000e+00> : vector<8x32xf32>
    %99 = tpu.matmul %97, %98, %cst_35 {dimension_numbers = #tpu.dot_dimension_numbers<[1], [0], [0], [1], [0, 0, 1, 1], [], []>} : vector<8x32xbf16>, vector<32x32xbf16>, vector<8x32xf32> -> vector<8x32xf32>
    %c0_36 = arith.constant 0 : index
    %c0_37 = arith.constant 0 : index
    %100 = vector.load %arg5[%c0_36, %c0_37] : memref<1x32xf32, #tpu.memory_space<vmem>>, vector<1x32xf32>
    %101 = vector.broadcast %100 : vector<1x32xf32> to vector<8x32xf32>
    %102 = arith.addf %99, %101 : vector<8x32xf32>
    %103 = arith.addf %1, %102 : vector<8x32xf32>
    %c0_38 = arith.constant 0 : index
    %c0_39 = arith.constant 0 : index
    %104 = vector.load %arg6[%c0_38, %c0_39] : memref<1x32xf32, #tpu.memory_space<vmem>>, vector<1x32xf32>
    %c0_40 = arith.constant 0 : index
    %c0_41 = arith.constant 0 : index
    %105 = vector.load %arg7[%c0_40, %c0_41] : memref<1x32xf32, #tpu.memory_space<vmem>>, vector<1x32xf32>
    %cst_42 = arith.constant dense<0.000000e+00> : vector<8xf32>
    %106 = vector.multi_reduction <add>, %103, %cst_42 [1] : vector<8x32xf32> to vector<8xf32>
    %107 = vector.shape_cast %106 : vector<8xf32> to vector<8x1xf32>
    %108 = arith.mulf %103, %103 : vector<8x32xf32>
    %cst_43 = arith.constant dense<0.000000e+00> : vector<8xf32>
    %109 = vector.multi_reduction <add>, %108, %cst_43 [1] : vector<8x32xf32> to vector<8xf32>
    %110 = vector.shape_cast %109 : vector<8xf32> to vector<8x1xf32>
    %cst_44 = arith.constant 3.125000e-02 : f32
    %111 = vector.broadcast %cst_44 : f32 to vector<8x1xf32>
    %112 = arith.mulf %107, %111 : vector<8x1xf32>
    %cst_45 = arith.constant 3.125000e-02 : f32
    %113 = vector.broadcast %cst_45 : f32 to vector<8x1xf32>
    %114 = arith.mulf %110, %113 : vector<8x1xf32>
    %115 = arith.mulf %112, %112 : vector<8x1xf32>
    %116 = arith.subf %114, %115 : vector<8x1xf32>
    %cst_46 = arith.constant 9.99999974E-6 : f32
    %117 = vector.broadcast %cst_46 : f32 to vector<8x1xf32>
    %118 = arith.addf %116, %117 : vector<8x1xf32>
    %119 = math.rsqrt %118 : vector<8x1xf32>
    %120 = vector.broadcast %112 : vector<8x1xf32> to vector<8x32xf32>
    %121 = arith.subf %103, %120 : vector<8x32xf32>
    %122 = vector.broadcast %119 : vector<8x1xf32> to vector<8x32xf32>
    %123 = arith.mulf %121, %122 : vector<8x32xf32>
    %124 = vector.broadcast %104 : vector<1x32xf32> to vector<8x32xf32>
    %125 = arith.mulf %123, %124 : vector<8x32xf32>
    %126 = vector.broadcast %105 : vector<1x32xf32> to vector<8x32xf32>
    %127 = arith.addf %125, %126 : vector<8x32xf32>
    %128 = arith.truncf %127 : vector<8x32xf32> to vector<8x32xbf16>
    %c0_47 = arith.constant 0 : index
    %c0_48 = arith.constant 0 : index
    %129 = vector.load %arg8[%c0_47, %c0_48] : memref<32x128xbf16, #tpu.memory_space<vmem>>, vector<32x128xbf16>
    %cst_49 = arith.constant dense<0.000000e+00> : vector<8x128xf32>
    %130 = tpu.matmul %128, %129, %cst_49 {dimension_numbers = #tpu.dot_dimension_numbers<[1], [0], [0], [1], [0, 0, 1, 1], [], []>} : vector<8x32xbf16>, vector<32x128xbf16>, vector<8x128xf32> -> vector<8x128xf32>
    %c0_50 = arith.constant 0 : index
    %c0_51 = arith.constant 0 : index
    %131 = vector.load %arg9[%c0_50, %c0_51] : memref<1x128xf32, #tpu.memory_space<vmem>>, vector<1x128xf32>
    %132 = vector.broadcast %131 : vector<1x128xf32> to vector<8x128xf32>
    %133 = arith.addf %130, %132 : vector<8x128xf32>
    %cst_52 = arith.constant 5.000000e-01 : f32
    %134 = vector.broadcast %cst_52 : f32 to vector<8x128xf32>
    %135 = arith.mulf %134, %133 : vector<8x128xf32>
    %cst_53 = arith.constant 0.707106769 : f32
    %136 = vector.broadcast %cst_53 : f32 to vector<8x128xf32>
    %137 = arith.mulf %133, %136 : vector<8x128xf32>
    %cst_54 = arith.constant 0.000000e+00 : f32
    %138 = vector.broadcast %cst_54 : f32 to vector<8x128xf32>
    %139 = arith.cmpf oge, %137, %138 : vector<8x128xf32>
    %cst_55 = arith.constant 1.000000e+00 : f32
    %cst_56 = arith.constant -1.000000e+00 : f32
    %140 = vector.broadcast %cst_55 : f32 to vector<8x128xf32>
    %141 = vector.broadcast %cst_56 : f32 to vector<8x128xf32>
    %142 = arith.select %139, %140, %141 : vector<8x128xi1>, vector<8x128xf32>
    %143 = math.absf %137 : vector<8x128xf32>
    %cst_57 = arith.constant 0.327591091 : f32
    %144 = vector.broadcast %cst_57 : f32 to vector<8x128xf32>
    %145 = arith.mulf %144, %143 : vector<8x128xf32>
    %cst_58 = arith.constant 1.000000e+00 : f32
    %146 = vector.broadcast %cst_58 : f32 to vector<8x128xf32>
    %147 = arith.addf %146, %145 : vector<8x128xf32>
    %148 = tpu.reciprocal %147 {approx = true} : vector<8x128xf32> -> vector<8x128xf32>
    %cst_59 = arith.constant 1.06140542 : f32
    %149 = vector.broadcast %cst_59 : f32 to vector<8x128xf32>
    %150 = arith.mulf %149, %148 : vector<8x128xf32>
    %cst_60 = arith.constant -1.45315206 : f32
    %151 = vector.broadcast %cst_60 : f32 to vector<8x128xf32>
    %152 = arith.addf %150, %151 : vector<8x128xf32>
    %153 = arith.mulf %152, %148 : vector<8x128xf32>
    %cst_61 = arith.constant 1.42141378 : f32
    %154 = vector.broadcast %cst_61 : f32 to vector<8x128xf32>
    %155 = arith.addf %153, %154 : vector<8x128xf32>
    %156 = arith.mulf %155, %148 : vector<8x128xf32>
    %cst_62 = arith.constant -0.284496725 : f32
    %157 = vector.broadcast %cst_62 : f32 to vector<8x128xf32>
    %158 = arith.addf %156, %157 : vector<8x128xf32>
    %159 = arith.mulf %158, %148 : vector<8x128xf32>
    %cst_63 = arith.constant 0.254829586 : f32
    %160 = vector.broadcast %cst_63 : f32 to vector<8x128xf32>
    %161 = arith.addf %159, %160 : vector<8x128xf32>
    %162 = arith.mulf %161, %148 : vector<8x128xf32>
    %cst_64 = arith.constant 0.000000e+00 : f32
    %163 = vector.broadcast %cst_64 : f32 to vector<8x128xf32>
    %164 = arith.subf %163, %143 : vector<8x128xf32>
    %165 = arith.mulf %164, %143 : vector<8x128xf32>
    %166 = math.exp %165 : vector<8x128xf32>
    %167 = arith.mulf %162, %166 : vector<8x128xf32>
    %cst_65 = arith.constant 1.000000e+00 : f32
    %168 = vector.broadcast %cst_65 : f32 to vector<8x128xf32>
    %169 = arith.subf %168, %167 : vector<8x128xf32>
    %170 = arith.mulf %142, %169 : vector<8x128xf32>
    %cst_66 = arith.constant 1.000000e+00 : f32
    %171 = vector.broadcast %cst_66 : f32 to vector<8x128xf32>
    %172 = arith.addf %171, %170 : vector<8x128xf32>
    %173 = arith.mulf %135, %172 : vector<8x128xf32>
    %174 = arith.truncf %173 : vector<8x128xf32> to vector<8x128xbf16>
    %c0_67 = arith.constant 0 : index
    %c0_68 = arith.constant 0 : index
    %175 = vector.load %arg10[%c0_67, %c0_68] : memref<128x32xbf16, #tpu.memory_space<vmem>>, vector<128x32xbf16>
    %cst_69 = arith.constant dense<0.000000e+00> : vector<8x32xf32>
    %176 = tpu.matmul %174, %175, %cst_69 {dimension_numbers = #tpu.dot_dimension_numbers<[1], [0], [0], [1], [0, 0, 1, 1], [], []>} : vector<8x128xbf16>, vector<128x32xbf16>, vector<8x32xf32> -> vector<8x32xf32>
    %c0_70 = arith.constant 0 : index
    %c0_71 = arith.constant 0 : index
    %177 = vector.load %arg11[%c0_70, %c0_71] : memref<1x32xf32, #tpu.memory_space<vmem>>, vector<1x32xf32>
    %178 = vector.broadcast %177 : vector<1x32xf32> to vector<8x32xf32>
    %179 = arith.addf %176, %178 : vector<8x32xf32>
    %180 = arith.addf %127, %179 : vector<8x32xf32>
    %c0_72 = arith.constant 0 : index
    %c0_73 = arith.constant 0 : index
    %181 = vector.load %arg12[%c0_72, %c0_73] : memref<1x32xf32, #tpu.memory_space<vmem>>, vector<1x32xf32>
    %c0_74 = arith.constant 0 : index
    %c0_75 = arith.constant 0 : index
    %182 = vector.load %arg13[%c0_74, %c0_75] : memref<1x32xf32, #tpu.memory_space<vmem>>, vector<1x32xf32>
    %cst_76 = arith.constant dense<0.000000e+00> : vector<8xf32>
    %183 = vector.multi_reduction <add>, %180, %cst_76 [1] : vector<8x32xf32> to vector<8xf32>
    %184 = vector.shape_cast %183 : vector<8xf32> to vector<8x1xf32>
    %185 = arith.mulf %180, %180 : vector<8x32xf32>
    %cst_77 = arith.constant dense<0.000000e+00> : vector<8xf32>
    %186 = vector.multi_reduction <add>, %185, %cst_77 [1] : vector<8x32xf32> to vector<8xf32>
    %187 = vector.shape_cast %186 : vector<8xf32> to vector<8x1xf32>
    %cst_78 = arith.constant 3.125000e-02 : f32
    %188 = vector.broadcast %cst_78 : f32 to vector<8x1xf32>
    %189 = arith.mulf %184, %188 : vector<8x1xf32>
    %cst_79 = arith.constant 3.125000e-02 : f32
    %190 = vector.broadcast %cst_79 : f32 to vector<8x1xf32>
    %191 = arith.mulf %187, %190 : vector<8x1xf32>
    %192 = arith.mulf %189, %189 : vector<8x1xf32>
    %193 = arith.subf %191, %192 : vector<8x1xf32>
    %cst_80 = arith.constant 9.99999974E-6 : f32
    %194 = vector.broadcast %cst_80 : f32 to vector<8x1xf32>
    %195 = arith.addf %193, %194 : vector<8x1xf32>
    %196 = math.rsqrt %195 : vector<8x1xf32>
    %197 = vector.broadcast %189 : vector<8x1xf32> to vector<8x32xf32>
    %198 = arith.subf %180, %197 : vector<8x32xf32>
    %199 = vector.broadcast %196 : vector<8x1xf32> to vector<8x32xf32>
    %200 = arith.mulf %198, %199 : vector<8x32xf32>
    %201 = vector.broadcast %181 : vector<1x32xf32> to vector<8x32xf32>
    %202 = arith.mulf %200, %201 : vector<8x32xf32>
    %203 = vector.broadcast %182 : vector<1x32xf32> to vector<8x32xf32>
    %204 = arith.addf %202, %203 : vector<8x32xf32>
    %c0_81 = arith.constant 0 : index
    %c0_82 = arith.constant 0 : index
    %c0_83 = arith.constant 0 : index
    %205 = vector.load %arg14[%c0_81, %c0_82, %c0_83] : memref<1x8x32xf32, #tpu.memory_space<vmem>>, vector<1x8x32xf32>
    %206 = vector.shape_cast %205 : vector<1x8x32xf32> to vector<8x32xf32>
    %207 = vector.shape_cast %204 : vector<8x32xf32> to vector<1x8x32xf32>
    tpu.vector_store %arg14[%c0_81, %c0_82, %c0_83], %207 {strides = array<i32>} : memref<1x8x32xf32, #tpu.memory_space<vmem>>, vector<1x8x32xf32>,
    return
  }
  func.func @transform_0(%arg0: i32) -> (i32, i32, i32) {
    %c0_i32 = arith.constant 0 : i32
    %c0_i32_0 = arith.constant 0 : i32
    %c0_i32_1 = arith.constant 0 : i32
    return %arg0, %c0_i32, %c0_i32_0 : i32, i32, i32
  }
  func.func @transform_1(%arg0: i32) -> (i32, i32) {
    %c0_i32 = arith.constant 0 : i32
    %c0_i32_0 = arith.constant 0 : i32
    %c0_i32_1 = arith.constant 0 : i32
    return %c0_i32, %c0_i32_0 : i32, i32
  }
  func.func @transform_2(%arg0: i32) -> (i32, i32) {
    %c0_i32 = arith.constant 0 : i32
    %c0_i32_0 = arith.constant 0 : i32
    %c0_i32_1 = arith.constant 0 : i32
    return %c0_i32, %c0_i32_0 : i32, i32
  }
  func.func @transform_3(%arg0: i32) -> (i32, i32) {
    %c0_i32 = arith.constant 0 : i32
    %c0_i32_0 = arith.constant 0 : i32
    %c0_i32_1 = arith.constant 0 : i32
    return %c0_i32, %c0_i32_0 : i32, i32
  }
  func.func @transform_4(%arg0: i32) -> (i32, i32) {
    %c0_i32 = arith.constant 0 : i32
    %c0_i32_0 = arith.constant 0 : i32
    %c0_i32_1 = arith.constant 0 : i32
    return %c0_i32, %c0_i32_0 : i32, i32
  }
  func.func @transform_5(%arg0: i32) -> (i32, i32) {
    %c0_i32 = arith.constant 0 : i32
    %c0_i32_0 = arith.constant 0 : i32
    %c0_i32_1 = arith.constant 0 : i32
    return %c0_i32, %c0_i32_0 : i32, i32
  }
  func.func @transform_6(%arg0: i32) -> (i32, i32) {
    %c0_i32 = arith.constant 0 : i32
    %c0_i32_0 = arith.constant 0 : i32
    %c0_i32_1 = arith.constant 0 : i32
    return %c0_i32, %c0_i32_0 : i32, i32
  }
  func.func @transform_7(%arg0: i32) -> (i32, i32) {
    %c0_i32 = arith.constant 0 : i32
    %c0_i32_0 = arith.constant 0 : i32
    %c0_i32_1 = arith.constant 0 : i32
    return %c0_i32, %c0_i32_0 : i32, i32
  }
  func.func @transform_8(%arg0: i32) -> (i32, i32) {
    %c0_i32 = arith.constant 0 : i32
    %c0_i32_0 = arith.constant 0 : i32
    %c0_i32_1 = arith.constant 0 : i32
    return %c0_i32, %c0_i32_0 : i32, i32
  }
  func.func @transform_9(%arg0: i32) -> (i32, i32) {
    %c0_i32 = arith.constant 0 : i32
    %c0_i32_0 = arith.constant 0 : i32
    %c0_i32_1 = arith.constant 0 : i32
    return %c0_i32, %c0_i32_0 : i32, i32
  }
  func.func @transform_10(%arg0: i32) -> (i32, i32) {
    %c0_i32 = arith.constant 0 : i32
    %c0_i32_0 = arith.constant 0 : i32
    %c0_i32_1 = arith.constant 0 : i32
    return %c0_i32, %c0_i32_0 : i32, i32
  }
  func.func @transform_11(%arg0: i32) -> (i32, i32) {
    %c0_i32 = arith.constant 0 : i32
    %c0_i32_0 = arith.constant 0 : i32
    %c0_i32_1 = arith.constant 0 : i32
    return %c0_i32, %c0_i32_0 : i32, i32
  }
  func.func @transform_12(%arg0: i32) -> (i32, i32) {
    %c0_i32 = arith.constant 0 : i32
    %c0_i32_0 = arith.constant 0 : i32
    %c0_i32_1 = arith.constant 0 : i32
    return %c0_i32, %c0_i32_0 : i32, i32
  }
  func.func @transform_13(%arg0: i32) -> (i32, i32, i32) {
    %c0_i32 = arith.constant 0 : i32
    %c0_i32_0 = arith.constant 0 : i32
    %c0_i32_1 = arith.constant 0 : i32
    return %arg0, %c0_i32, %c0_i32_0 : i32, i32, i32
  }
}

</mosaic_0001>

<bundles_post_ra>
// kernel: tpu_custom_call.1
= control target key start
LH: loop header
LB: loop body
LE: loop exit
PB: predicated region body
PF: predicated region fallthrough
CT: control target
= control target key end

     0   :  { %s1583_s0 = inlined_call_operand.vmem [shape: f32[2,8,32], index: 0, kind: input, shape index: {}]   ;;  %s1584_s1 = inlined_call_operand.vmem [shape: bf16[32,96], index: 1, kind: input, shape index: {}]   ;;  %s1585_s2 = inlined_call_operand.vmem [shape: f32[1,96], index: 2, kind: input, shape index: {}]   ;;  %s1586_s3 = inlined_call_operand.vmem [shape: bf16[32,32], index: 3, kind: input, shape index: {}]   ;;  %s1587_s4 = inlined_call_operand.vmem [shape: f32[1,32], index: 4, kind: input, shape index: {}]   ;;  %s1588_s5 = inlined_call_operand.vmem [shape: f32[1,32], index: 5, kind: input, shape index: {}]   ;;  %s1589_s6 = inlined_call_operand.vmem [shape: f32[1,32], index: 6, kind: input, shape index: {}]   ;;  %s1590_s7 = inlined_call_operand.vmem [shape: bf16[32,128], index: 7, kind: input, shape index: {}]   ;;  %s1591_s8 = inlined_call_operand.vmem [shape: f32[1,128], index: 8, kind: input, shape index: {}]   ;;  %s1592_s9 = inlined_call_operand.vmem [shape: bf16[128,32], index: 9, kind: input, shape index: {}]   ;;  %s1593_s10 = inlined_call_operand.vmem [shape: f32[1,32], index: 10, kind: input, shape index: {}]   ;;  %s1594_s11 = inlined_call_operand.vmem [shape: f32[1,32], index: 11, kind: input, shape index: {}]   ;;  %s1595_s12 = inlined_call_operand.vmem [shape: f32[1,32], index: 12, kind: input, shape index: {}]   ;;  %s1596_s13 = inlined_call_operand.hbm [shape: f32[2,8,32], index: 13, kind: output, shape index: {}]  }
   0x1   :  { %1597 = sst [smem:[#allocation7_spill]] %s1583_s0 }
   0x2   :  { %1598 = sst [smem:[#allocation8_spill]] %s1584_s1 }
   0x3   :  { %1599 = sst [smem:[#allocation9_spill]] %s1585_s2 }
   0x4   :  { %18 = vsyncpa [#allocation4], 0 }
   0x5   :  { %20 = vsyncpa [#allocation4 + $0x1], 0  ;;  %s1380_s25 = smov 0   ;;  %s1382_s26 = smov 0  }
   0x6   :  { %s1384_s27 = smov 0   ;;  %s1386_s28 = smov 0  }
   0x7 LB: > { %s1401_s29 = sadd.s32 4294967295, %s1293_s28   ;;  %s1054_s30 = sadd.s32 4294967294, %s1293_s28   ;;  %s1293_s28 = sphi %s1386_s28, %s1610_s28   ;;  %s1289_s27 = sphi %s1384_s27, %s1609_s27   ;;  %s1285_s26 = sphi %s1382_s26, %s1608_s26   ;;  %s1281_s25 = sphi %s1380_s25, %s1607_s25  }
   0x8   : > { %s1405_s14 = sadd.s32 1, %s1293_s28   ;;  %s311_s15 = sadd.s32 1, %s1289_s27 }
   0x9   : > { %s308_s16 = ssub.s32 %s1293_s28, %s1405_s14  ;;  %p321_p0 = scmp.ne.s32.totalorder %s1289_s27, %s1285_s26 }
   0xa   : > { %p309_p1 = scmp.eq.s32.totalorder %s308_s16, 0  ;;  %p322_p2 = scmp.eq.s32.totalorder %s1401_s29, 1 }
   0xb   : > { %p327_p3 = scmp.ne.s32.totalorder %s1285_s26, %s1281_s25  ;;  %p328_p4 = scmp.eq.s32.totalorder %s1054_s30, 1 }
   0xc   : > { %s1416_s17 = scalar_select %p309_p1, %s1289_s27, %s311_s15  }
   0xd   : > { %p1418_p5 = por %p322_p2, %p321_p0  ;;  %p1422_p6 = por %p328_p4, %p327_p3 }
   0xe   : > { %1600 = sst [smem:[#allocation6_spill]] %s1416_s17  ;;  %p1057_p7 = scmp.ge.s32.totalorder %s1293_s28, 1 }
   0xf   : > { %p389_p8 = scmp.lt.s32.totalorder %s1293_s28, 3 }
  0x11   : > { %p390_p9 = pnand %p1057_p7, %p389_p8 }
  0x12   : > { %s1603_s1 = sld [smem:[#allocation8_spill]] (!%p390_p9)  ;;  %p432_p10 = scmp.lt.s32.totalorder (!%p390_p9), %s1401_s29, 1 }
  0x13   : > { %393 = sbr.rel (%p390_p9) target bundleno = 2107 (0x83b), region = 72  ;;  %s1604_s0 = sld [smem:[#allocation7_spill]] (!%p390_p9) }
  0x14   : > { %s1605_s2 = sld [smem:[#allocation9_spill]] (!%p390_p9)  ;;  %s1295_s22 = smov (!%p390_p9), 88  }
  0x15   : > { %s1296_s23 = smov (!%p390_p9), 96   ;;  %s1300_s15 = smov (!%p390_p9), 80  }
  0x16   : > { %s1301_s16 = smov (!%p390_p9), 64   ;;  %s1302_s20 = smov (!%p390_p9), 112  }
  0x17   : > { %s1303_s21 = smov (!%p390_p9), 56  }
  0x18   : > { %v1132_v0 = vld [vmem:[%s1603_s1 + $0x8] sm:$0xff]  ;;  %v1131_v1 = vld [vmem:[%s1603_s1] sm:$0xff]  ;;  %s433_s24 = scalar_select %p432_p10, %s1401_s29, 1  ;;  %vm459_vm0 = vcmask 261120   ;;  %vm480_vm1 = vcmask 64512   ;;  %vm518_vm2 = vcmask 1043456  }
  0x19   : > { %469 = vmatpush.bf16.msra.mxu0 %v1132_v0  ;;  %vm597_vm3 = vcmask 130112   ;;  %vm660_vm4 = vcmask 195712   ;;  %vm723_vm5 = vcmask 261312  }
  0x1a   : > { %s1059_s30 = sshll.u32 %s433_s24, 3  ;;  %v1199_v4 = vld [vmem:[%s1605_s2] ss:$0 sm:$0xff]  ;;  %s1298_s24 = smov 72  }
  0x1b   : > { %s435_s17 = scalar_lea.vmem %s1604_s0, %s1059_s30  ;;  %s1299_s30 = smov 104  }
  0x1c   : > { %v1439_v2 = vld [vmem:[%s435_s17] sm:$0xff]  ;;  %s1297_s17 = smov 120  }
  0x1d   : > { %470 = vmatpush.bf16.msra.mxu0 %v1131_v1  ;;  %v438_v3 = vpack.c.bf16 %v1439_v2, %v1439_v2 }
  0x20   : > { %1068 = vmatmul.msk.bf16.vlgmr.msra.gmra.mxu0 %vm459_vm0, %v438_v3 }
  0x9d   : > { %v472_v5 = vpop.f32.mrf.mxu0 }
  0x9e   : > { %v473_v6 = vadd.f32 %v1199_v4, %v472_v5 }
  0xa0   : > { %v1447_v7 = vpack.c.bf16 %v473_v6, %v473_v6 }
  0xa2   : > { %538 = vrot.lane.b32.xlu2 %v1447_v7, %s1295_s22  ;;  %478 = vrot.lane.b32.xlu0 %v1447_v7, %s1296_s23  ;;  %s1304_s22 = smov 48   ;;  %s1305_s23 = smov 40  }
  0xa5   : > { %v474_v8 = vpop.f32.mrf.mxu0 }
  0xaa   : > { %536 = vrot.lane.b32.xlu2 %v1447_v7, %s1297_s17  ;;  %s1306_s17 = smov 16  }
  0xb2   : > { %664 = vrot.lane.b32.xlu2 %v1447_v7, %s1298_s24  ;;  %s1307_s24 = smov 8  }
  0xba   : > { %662 = vrot.lane.b32.xlu2 %v1447_v7, %s1299_s30  ;;  %s1308_s30 = smov 24  }
  0xc2   : > { %601 = vrot.lane.b32.xlu2 %v1447_v7, %s1300_s15 }
  0xfc   : > { %v539_v9 = vpop.permute.xlu2 %538 }
  0xfd   : > { %v544_v36 = vsel %vm480_vm1, %v539_v9, 0 }
 0x104   : > { %v537_v10 = vpop.permute.xlu2 %536 }
 0x10c   : > { %v665_v11 = vpop.permute.xlu2 %664 }
 0x10d   : > { %v670_v12 = vsel %vm480_vm1, %v665_v11, 0 }
 0x10e   : > { %679 = vmatpush.bf16.xpose.msra.mxu3 %v670_v12 }
 0x114   : > { %v663_v13 = vpop.permute.xlu2 %662  ;;  %v479_v14 = vpop.permute.xlu0 %478 }
 0x115   : > { %1075 = vmatmul.msk.bf16.vlgmr.msra.gmra.mxu3 %vm480_vm1, %v663_v13  ;;  %v485_v15 = vsel %vm480_vm1, %v479_v14, 0 }
 0x116   : > { %494 = vmatpush.bf16.xpose.msra.mxu1 %v485_v15 }
 0x11c   : > { %v602_v16 = vpop.permute.xlu2 %601 }
 0x11d   : > { %1069 = vmatmul.msk.bf16.vlgmr.msra.gmra.mxu1 %vm480_vm1, %v1447_v7  ;;  %v607_v17 = vsel %vm480_vm1, %v602_v16, 0 }
 0x11e   : > { %616 = vmatpush.bf16.xpose.msrb.mxu0 %v607_v17 }
 0x198   : > { %v681_v18 = vpop.f32.mrf.mxu3 }
 0x199   : > { %v685_v29 = vmul.f32 0.35355338, %v681_v18 }
 0x19a   : > { %v496_v19 = vpop.f32.mrf.mxu1 }
 0x19b   : > { %v500_v20 = vmul.f32 0.35355338, %v496_v19  ;;  %v686_v30 = vsel %vm480_vm1, %v685_v29, -inf }
 0x19d   : > { %v501_v21 = vsel %vm480_vm1, %v500_v20, -inf }
 0x19e   : > { %502 = vmax.xlane.f32.xlu0 %v501_v21 }
 0x1a0   : > { %v683_v22 = vpop.f32.mrf.mxu3 }
 0x1a2   : > { %v498_v23 = vpop.f32.mrf.mxu1 }
 0x211   : > { %v503_v24 = vpop.xlane.xlu0 %502 }
 0x212   : > { %v504_v25 = vsub.f32 %v500_v20, %v503_v24 }
 0x214   : > { %v505_v26 = vmul.f32 1.442695, %v504_v25  ;;  %v1134_v25 = vld [vmem:[%s1586_s3 + $0x8] sm:$0xff] }
 0x215   : > { %756 = vmatpush.bf16.msra.mxu0 %v1134_v25 }
 0x216   : > { %1207 = vpow2.f32 %v505_v26  ;;  %v1133_v26 = vld [vmem:[%s1586_s3] sm:$0xff] }
 0x219   : > { %757 = vmatpush.bf16.msra.mxu0 %v1133_v26 }
 0x21c   : > { %v1208_v27 = vpop.eup %1207 }
 0x21d   : > { %v507_v28 = vsel %vm480_vm1, %v1208_v27, 0.0 }
 0x21e   : > { %508 = vadd.xlane.f32.xlu1 %v507_v28 }
 0x237   : > { %513 = vrot.lane.b32.xlu1 %v1447_v7, %s1301_s16 }
 0x23f   : > { %599 = vrot.lane.b32.xlu1 %v1447_v7, %s1302_s20 }
 0x269   : > { %687 = vmax.xlane.f32.xlu1 %v686_v30 }
 0x291   : > { %v509_v31 = vpop.xlane.xlu1 %508 }
 0x292   : > { %1209 = vrcp.f32 %v509_v31 }
 0x298   : > { %v1210_v32 = vpop.eup %1209 }
 0x299   : > { %v511_v33 = vmul.f32 %v1210_v32, %v1208_v27  ;;  %v1200_v32 = vld [vmem:[%s1587_s4] ss:$0 sm:$0xff] }
 0x29b   : > { %v512_v37 = vpack.c.bf16 %v511_v33, %v511_v33 }
 0x2a9   : > { %v514_v34 = vpop.permute.xlu1 %513 }
 0x2aa   : > { %v520_v35 = vsel %vm518_vm2, %v514_v34, 0 }
 0x2ab   : > { %529 = vmatpush.bf16.msra.mxu2 %v520_v35 }
 0x2ae   : > { %1070 = vmatmul.msk.bf16.vlgmr.msra.gmra.mxu2 %vm480_vm1, %v512_v37 }
 0x2af   : > { %553 = vmatpush.bf16.xpose.msrb.mxu2 %v544_v36 }
 0x2b1   : > { %v600_v38 = vpop.permute.xlu1 %599 }
 0x2b2   : > { %1073 = vmatmul.msk.bf16.vlgmr.msrb.gmra.mxu0 %vm480_vm1, %v600_v38 }
 0x2be   : > { %1071 = vmatmul.msk.bf16.vlgmr.msrb.gmra.mxu2 %vm480_vm1, %v537_v10 }
 0x2dc   : > { %v688_v44 = vpop.xlane.xlu1 %687 }
 0x2dd   : > { %v689_v46 = vsub.f32 %v685_v29, %v688_v44 }
 0x2df   : > { %v690_v47 = vmul.f32 1.442695, %v689_v46 }
 0x2e1   : > { %1211 = vpow2.f32 %v690_v47 }
 0x2e7   : > { %v1212_v51 = vpop.eup %1211 }
 0x2e8   : > { %v692_v53 = vsel %vm480_vm1, %v1212_v51, 0.0 }
 0x32f   : > { %v618_v39 = vpop.f32.mrf.mxu0 }
 0x330   : > { %v622_v40 = vmul.f32 0.35355338, %v618_v39 }
 0x331   : > { %v531_v41 = vpop.f32.mrf.mxu2 }
 0x332   : > { %535 = vst.msk [vmem:[#allocation2] sm:$0xff] %vm480_vm1, %v531_v41  ;;  %v623_v42 = vsel %vm480_vm1, %v622_v40, -inf  ;;  %v1135_v41 = vld [vmem:[%s1590_s7] sm:$0xff] }
 0x333   : > { %624 = vmax.xlane.f32.xlu0 %v623_v42 }
 0x337   : > { %v620_v43 = vpop.f32.mrf.mxu0 }
 0x339   : > { %v533_v45 = vpop.f32.mrf.mxu2 }
 0x341   : > { %v555_v48 = vpop.f32.mrf.mxu2 }
 0x342   : > { %v559_v49 = vmul.f32 0.35355338, %v555_v48 }
 0x344   : > { %v560_v50 = vsel %vm480_vm1, %v559_v49, -inf }
 0x345   : > { %561 = vmax.xlane.f32.xlu2 %v560_v50 }
 0x347   : > { %572 = vrot.lane.b32.xlu0 %v1447_v7, %s1303_s21 }
 0x349   : > { %v557_v52 = vpop.f32.mrf.mxu2 }
 0x34d   : > { %693 = vadd.xlane.f32.xlu2 %v692_v53 }
 0x365   : > { %635 = vrot.lane.b32.xlu2 %v1447_v7, %s1304_s22 }
 0x3a6   : > { %v625_v54 = vpop.xlane.xlu0 %624 }
 0x3a7   : > { %v626_v55 = vsub.f32 %v622_v40, %v625_v54  ;;  %v1136_v40 = vld [vmem:[%s1590_s7 + $0x8] sm:$0xff] }
 0x3a9   : > { %v627_v56 = vmul.f32 1.442695, %v626_v55  ;;  %v1201_v55 = vld [vmem:[%s1588_s5] ss:$0 sm:$0xff] }
 0x3ab   : > { %1213 = vpow2.f32 %v627_v56 }
 0x3b1   : > { %v1214_v57 = vpop.eup %1213 }
 0x3b2   : > { %v629_v58 = vsel %vm480_vm1, %v1214_v57, 0.0 }
 0x3b3   : > { %630 = vadd.xlane.f32.xlu1 %v629_v58  ;;  %v1202_v58 = vld [vmem:[%s1589_s6] ss:$0 sm:$0xff] }
 0x3b8   : > { %v562_v59 = vpop.xlane.xlu2 %561 }
 0x3b9   : > { %v563_v60 = vsub.f32 %v559_v49, %v562_v59  ;;  %v573_v61 = vpop.permute.xlu0 %572 }
 0x3ba   : > { %v578_v62 = vsel %vm518_vm2, %v573_v61, 0 }
 0x3bb   : > { %v564_v63 = vmul.f32 1.442695, %v563_v60  ;;  %587 = vmatpush.bf16.msra.mxu2 %v578_v62  ;;  %v1144_v62 = vld [vmem:[%s1592_s9 + $0x38] sm:$0xff] }
 0x3bc   : > { %930 = vmatpush.bf16.msrb.mxu3 %v1144_v62  ;;  %v1206_v62 = vld [vmem:[%s1595_s12] ss:$0 sm:$0xff] }
 0x3bd   : > { %1215 = vpow2.f32 %v564_v63  ;;  %v1143_v63 = vld [vmem:[%s1592_s9 + $0x30] sm:$0xff] }
 0x3c0   : > { %v694_v0 = vpop.xlane.xlu2 %693  ;;  %931 = vmatpush.bf16.msrb.mxu3 %v1143_v63 }
 0x3c3   : > { %v1216_v1 = vpop.eup %1215 }
 0x3c4   : > { %v566_v3 = vsel %vm480_vm1, %v1216_v1, 0.0 }
 0x3c5   : > { %567 = vadd.xlane.f32.xlu0 %v566_v3  ;;  %v1203_v3 = vld [vmem:[%s1591_s8] ss:$0 sm:$0xff] }
 0x3c8   : > { %v636_v4 = vpop.permute.xlu2 %635 }
 0x3c9   : > { %v641_v5 = vsel %vm518_vm2, %v636_v4, 0  ;;  %v1140_v4 = vld [vmem:[%s1592_s9 + $0x18] sm:$0xff] }
 0x3ca   : > { %650 = vmatpush.bf16.msrb.mxu1 %v641_v5 }
 0x3ce   : > { %828 = vmatpush.bf16.msra.mxu1 %v1136_v40 }
 0x3d2   : > { %829 = vmatpush.bf16.msra.mxu1 %v1135_v41 }
 0x3d9   : > { %698 = vrot.lane.b32.xlu0 %v1447_v7, %s1305_s23  ;;  %s429_s23 = sand.u32 1, %s1285_s26  }
 0x426   : > { %v631_v6 = vpop.xlane.xlu1 %630 }
 0x427   : > { %1217 = vrcp.f32 %v631_v6 }
 0x42d   : > { %v1218_v8 = vpop.eup %1217 }
 0x42e   : > { %v633_v9 = vmul.f32 %v1218_v8, %v1214_v57 }
 0x430   : > { %v634_v10 = vpack.c.bf16 %v633_v9, %v633_v9  ;;  %v1139_v9 = vld [vmem:[%s1592_s9 + $0x10] sm:$0xff] }
 0x432   : > { %1074 = vmatmul.msk.bf16.vlgmr.msrb.gmra.mxu1 %vm480_vm1, %v634_v10 }
 0x438   : > { %v568_v11 = vpop.xlane.xlu0 %567 }
 0x439   : > { %1219 = vrcp.f32 %v568_v11 }
 0x43a   : > { %1221 = vrcp.f32 %v694_v0  ;;  %v1142_v0 = vld [vmem:[%s1592_s9 + $0x28] sm:$0xff] }
 0x43b   : > { %932 = vmatpush.bf16.msrb.mxu3 %v1142_v0 }
 0x43f   : > { %v1220_v12 = vpop.eup %1219 }
 0x440   : > { %v570_v13 = vmul.f32 %v1220_v12, %v1216_v1  ;;  %v1222_v15 = vpop.eup %1221  ;;  %v1141_v1 = vld [vmem:[%s1592_s9 + $0x20] sm:$0xff]  ;;  %v1138_v12 = vld [vmem:[%s1592_s9 + $0x8] sm:$0xff] }
 0x441   : > { %v696_v7 = vmul.f32 %v1222_v15, %v1212_v51  ;;  %933 = vmatpush.bf16.msrb.mxu3 %v1141_v1  ;;  %v1137_v15 = vld [vmem:[%s1592_s9] sm:$0xff] }
 0x442   : > { %v571_v14 = vpack.c.bf16 %v570_v13, %v570_v13 }
 0x443   : > { %v697_v18 = vpack.c.bf16 %v696_v7, %v696_v7 }
 0x444   : > { %1072 = vmatmul.msk.bf16.vlgmr.msra.gmra.mxu2 %vm480_vm1, %v571_v14 }
 0x445   : > { %934 = vmatpush.bf16.msrb.mxu3 %v1140_v4 }
 0x449   : > { %935 = vmatpush.bf16.msrb.mxu3 %v1139_v9 }
 0x44b   : > { %v699_v16 = vpop.permute.xlu0 %698 }
 0x44c   : > { %v704_v17 = vsel %vm518_vm2, %v699_v16, 0 }
 0x44d   : > { %713 = vmatpush.bf16.msrb.mxu2 %v704_v17  ;;  %936 = vmatpush.bf16.msrb.mxu3 %v1138_v12 }
 0x451   : > { %937 = vmatpush.bf16.msrb.mxu3 %v1137_v15 }
 0x454   : > { %1076 = vmatmul.msk.bf16.vlgmr.msrb.gmra.mxu2 %vm480_vm1, %v697_v18 }
 0x4af   : > { %v652_v19 = vpop.f32.mrf.mxu1 }
 0x4b0   : > { %657 = vrot.lane.b32.xlu0 %v652_v19, %s1306_s17  ;;  %s1058_s17 = sshll.u32 %s429_s23, 3 }
 0x4b7   : > { %v654_v20 = vpop.f32.mrf.mxu1 }
 0x4c7   : > { %v589_v21 = vpop.f32.mrf.mxu2 }
 0x4c8   : > { %594 = vrot.lane.b32.xlu1 %v589_v21, %s1307_s24  ;;  %s1128_s24 = sshll.u32 %s1401_s29, 3  ;;  %s431_s29 = scalar_lea.vmem [#allocation3], %s1058_s17 }
 0x4c9   : > { %s990_s20 = scalar_lea.hbm %s1596_s13, %s1128_s24  ;;  %s992_s1 = sshll.u32 %s431_s29, 4  ;;  %s993_s1 = int_to_ptr.vmem [resolvable:$true] %s992_s1 }
 0x4ca   : > { %s994_s2 = sshll.u32 %s990_s20, 4  ;;  %s1251_s17 = scalar_lea.hbm %s1596_s13, 16  ;;  %s995_s2 = int_to_ptr.hbm [resolvable:$true] %s994_s2 }
 0x4cb   : > { %s1245_s15 = sshra.s32 %s995_s2, 4  ;;  %s1246_s15 = int_to_ptr.hbm [resolvable:$true] %s1245_s15 }
 0x4cc   : > { %s1247_s24 = scalar_lea.hbm %s1246_s15, 8  ;;  %p1252_p0 = scmp.lt.s32.totalorder %s1246_s15, %s1596_s13 }
 0x4cd   : > { %p1248_p11 = scmp.ne.s32.totalorder %s1246_s15, %s1247_s24  ;;  %p1253_p1 = scmp.lt.s32.totalorder %s1251_s17, %s1247_s24 }
 0x4cf   : > { %v591_v22 = vpop.f32.mrf.mxu2  ;;  %p1249_p12 = pnand %p1248_p11, %p1418_p5  ;;  %p1254_p2 = por %p1253_p1, %p1252_p0 }
 0x4d1   : > { %p1250_p13 = pneg %p1249_p12 }
 0x4d3   : > { %p1255_p3 = pnand %p1254_p2, %p1250_p13 }
 0x4d7   : > { %v715_v23 = vpop.f32.mrf.mxu2 }
 0x4d8   : > { %720 = vrot.lane.b32.xlu0 %v715_v23, %s1308_s30  ;;  %s980_s30 = scalar_lea.sflag [#allocation4], %s429_s23 }
 0x4df   : > { %v717_v24 = vpop.f32.mrf.mxu2 }
 0x522   : > { %v658_v28 = vpop.permute.xlu0 %657 }
 0x53a   : > { %v595_v27 = vpop.permute.xlu1 %594 }
 0x53b   : > { %598 = vst.msk [vmem:[#allocation2] sm:$0xff] %vm597_vm3, %v595_v27 }
 0x53c   : > { %661 = vst.msk [vmem:[#allocation2] sm:$0xff] %vm660_vm4, %v658_v28 }
 0x54a   : > { %v721_v29 = vpop.permute.xlu0 %720 }
 0x54b   : > { %724 = vst.msk [vmem:[#allocation2] sm:$0xff] %vm723_vm5, %v721_v29 }
 0x552   : > { %v725_v30 = vld [vmem:[#allocation2] sm:$0xff] }
 0x553   : > { %v726_v31 = vpack.c.bf16 %v725_v30, %v725_v30 }
 0x555   : > { %1085 = vmatmul.msk.bf16.vlgmr.msra.gmra.mxu0 %vm459_vm0, %v726_v31  ;;  %v1309_v31 = vmov -1.0  }
 0x5d2   : > { %v759_v33 = vpop.f32.mrf.mxu0 }
 0x5d3   : > { %v760_v34 = vadd.f32 %v1200_v32, %v759_v33 }
 0x5d5   : > { %v763_v35 = vadd.f32 %v760_v34, %v1439_v2 }
 0x5d7   : > { %v766_v36 = vsel %vm459_vm0, %v763_v35, 0.0  ;;  %v769_v37 = vmul.f32 %v763_v35, %v763_v35 }
 0x5d8   : > { %767 = vadd.xlane.f32.xlu0 %v766_v36 }
 0x5d9   : > { %v770_v38 = vsel %vm459_vm0, %v769_v37, 0.0 }
 0x5da   : > { %v761_v39 = vpop.f32.mrf.mxu0  ;;  %771 = vadd.xlane.f32.xlu2 %v770_v38  ;;  %v1204_v38 = vld [vmem:[%s1593_s10] ss:$0 sm:$0xff] }
 0x64b   : > { %v768_v42 = vpop.xlane.xlu0 %767 }
 0x64c   : > { %v773_v2 = vmul.f32 0.03125, %v768_v42 }
 0x64d   : > { %v772_v43 = vpop.xlane.xlu2 %771 }
 0x64e   : > { %v775_v44 = vmul.f32 %v773_v2, %v773_v2  ;;  %v774_v45 = vmul.f32 0.03125, %v772_v43  ;;  %v788_v54 = vsub.f32 %v763_v35, %v773_v2 }
 0x650   : > { %v776_v46 = vsub.f32 %v774_v45, %v775_v44 }
 0x652   : > { %v777_v47 = vadd.f32 1e-05, %v776_v46 }
 0x654   : > { %1223 = vrsqrt.f32 %v777_v47  ;;  %vm784_vm7 = vweird.f32 %v777_v47 }
 0x65a   : > { %v1224_v48 = vpop.eup %1223 }
 0x65b   : > { %v779_v49 = vmul.f32 %v1224_v48, %v777_v47  ;;  %vm785_vm6 = vweird.f32 %v1224_v48 }
 0x65c   : > { %vm786_vm8 = vmor %vm784_vm7, %vm785_vm6 }
 0x65d   : > { %v780_v50 = vmul.f32 %v1224_v48, %v779_v49 }
 0x65f   : > { %v781_v51 = vmul.f32 0.5, %v780_v50 }
 0x661   : > { %v782_v52 = vsub.f32 1.5, %v781_v51 }
 0x663   : > { %v783_v53 = vmul.f32 %v1224_v48, %v782_v52 }
 0x665   : > { %v787_v56 = vsel %vm786_vm8, %v1224_v48, %v783_v53 }
 0x666   : > { %v789_v57 = vmul.f32 %v788_v54, %v787_v56 }
 0x668   : > { %v793_v59 = vmul.f32 %v1201_v55, %v789_v57 }
 0x66a   : > { %v797_v60 = vadd.f32 %v1202_v58, %v793_v59  ;;  %v1205_v59 = vld [vmem:[%s1594_s11] ss:$0 sm:$0xff] }
 0x66c   : > { %v798_v61 = vpack.c.bf16 %v797_v60, %v797_v60 }
 0x66e   : > { %1094 = vmatmul.msk.bf16.vlgmr.msra.gmra.mxu1 %vm459_vm0, %v798_v61 }
 0x6eb   : > { %v831_v5 = vpop.f32.mrf.mxu1 }
 0x6ec   : > { %v832_v6 = vadd.f32 %v1203_v3, %v831_v5 }
 0x6ee   : > { %v836_v8 = vmul.f32 0.70710677, %v832_v6  ;;  %v835_v34 = vmul.f32 0.5, %v832_v6 }
 0x6f0   : > { %v839_v10 = vand.u32 2147483647, %v836_v8  ;;  %vm837_vm9 = vcmp.ge.f32.partialorder %v836_v8, 0.0 }
 0x6f1   : > { %v838_v32 = vsel %vm837_vm9, 1.0, %v1309_v31 }
 0x6f2   : > { %v840_v11 = vmul.f32 0.3275911, %v839_v10  ;;  %v852_v17 = vsub.f32 0.0, %v839_v10 }
 0x6f3   : > { %v833_v13 = vpop.f32.mrf.mxu1 }
 0x6f4   : > { %v841_v14 = vadd.f32 1.0, %v840_v11  ;;  %v853_v19 = vmul.f32 %v852_v17, %v839_v10 }
 0x6f6   : > { %1225 = vrcp.f32 %v841_v14  ;;  %v854_v22 = vmul.f32 1.442695, %v853_v19 }
 0x6f8   : > { %1227 = vpow2.f32 %v854_v22 }
 0x6fc   : > { %v1226_v16 = vpop.eup %1225 }
 0x6fd   : > { %v843_v7 = vmul.f32 1.0614054, %v1226_v16 }
 0x6fe   : > { %v1228_v28 = vpop.eup %1227 }
 0x6ff   : > { %v844_v18 = vadd.f32 -1.4531521, %v843_v7 }
 0x701   : > { %v845_v20 = vmul.f32 %v1226_v16, %v844_v18 }
 0x703   : > { %v846_v21 = vadd.f32 1.4214138, %v845_v20 }
 0x705   : > { %v847_v23 = vmul.f32 %v1226_v16, %v846_v21 }
 0x707   : > { %v848_v24 = vadd.f32 -0.28449672, %v847_v23 }
 0x709   : > { %v849_v25 = vmul.f32 %v1226_v16, %v848_v24 }
 0x70b   : > { %v850_v26 = vadd.f32 0.2548296, %v849_v25 }
 0x70d   : > { %v851_v27 = vmul.f32 %v1226_v16, %v850_v26 }
 0x70f   : > { %v856_v29 = vmul.f32 %v1228_v28, %v851_v27 }
 0x711   : > { %v857_v30 = vsub.f32 1.0, %v856_v29 }
 0x713   : > { %v858_v33 = vmul.f32 %v857_v30, %v838_v32 }
 0x715   : > { %v859_v35 = vadd.f32 1.0, %v858_v33 }
 0x717   : > { %v860_v36 = vmul.f32 %v859_v35, %v835_v34 }
 0x719   : > { %v861_v37 = vpack.c.bf16 %v860_v36, %v860_v36 }
 0x71b   : > { %938 = vmatmul.bf16.vlgmr.msrb.gmra.mxu3 %v861_v37 }
 0x79e   : > { %v939_v39 = vpop.f32.mrf.mxu3 }
 0x79f   : > { %v940_v40 = vadd.f32 %v1204_v38, %v939_v39 }
 0x7a1   : > { %v943_v41 = vadd.f32 %v940_v40, %v797_v60 }
 0x7a3   : > { %v946_v42 = vsel %vm459_vm0, %v943_v41, 0.0  ;;  %v949_v2 = vmul.f32 %v943_v41, %v943_v41 }
 0x7a4   : > { %947 = vadd.xlane.f32.xlu1 %v946_v42 }
 0x7a5   : > { %v950_v43 = vsel %vm459_vm0, %v949_v2, 0.0 }
 0x7a6   : > { %v941_v44 = vpop.f32.mrf.mxu3  ;;  %951 = vadd.xlane.f32.xlu0 %v950_v43 }
 0x817   : > { %v948_v45 = vpop.xlane.xlu1 %947 }
 0x818   : > { %v953_v46 = vmul.f32 0.03125, %v948_v45 }
 0x819   : > { %v952_v47 = vpop.xlane.xlu0 %951 }
 0x81a   : > { %v955_v48 = vmul.f32 %v953_v46, %v953_v46  ;;  %v954_v49 = vmul.f32 0.03125, %v952_v47  ;;  %v968_v58 = vsub.f32 %v943_v41, %v953_v46 }
 0x81c   : > { %v956_v50 = vsub.f32 %v954_v49, %v955_v48 }
 0x81e   : > { %v957_v51 = vadd.f32 1e-05, %v956_v50 }
 0x820   : > { %1229 = vrsqrt.f32 %v957_v51  ;;  %vm964_vm11 = vweird.f32 %v957_v51 }
 0x826   : > { %v1230_v52 = vpop.eup %1229 }
 0x827   : > { %v959_v53 = vmul.f32 %v1230_v52, %v957_v51  ;;  %vm965_vm10 = vweird.f32 %v1230_v52 }
 0x828   : > { %vm966_vm12 = vmor %vm964_vm11, %vm965_vm10 }
 0x829   : > { %v960_v54 = vmul.f32 %v1230_v52, %v959_v53 }
 0x82b   : > { %v961_v55 = vmul.f32 0.5, %v960_v54 }
 0x82d   : > { %v962_v56 = vsub.f32 1.5, %v961_v55 }
 0x82f   : > { %v963_v57 = vmul.f32 %v1230_v52, %v962_v56 }
 0x831   : > { %v967_v60 = vsel %vm966_vm12, %v1230_v52, %v963_v57 }
 0x832   : > { %v969_v61 = vmul.f32 %v968_v58, %v967_v60 }
 0x834   : > { %v973_v63 = vmul.f32 %v1205_v59, %v969_v61 }
 0x836   : > { %v977_v0 = vadd.f32 %v1206_v62, %v973_v63 }
 0x838   : > { %978 = vst.msk [vmem:[%s431_s29] sm:$0xff] %vm459_vm0, %v977_v0 }
 0x839   : > { %1258 = shalt.err (!%p1255_p3)
}
 0x83a   : > { %1145 = dma.vmem_to_hbm [thread:$0]  (%p1418_p5), %s993_s1, 128, %s995_s2, %s980_s30  }
 0x83b PF: > { %p1151_p4 = scmp.ge.s32.totalorder %s1293_s28, 2  ;;  %s1006_s23 = sand.u32 1, %s1281_s25  }
 0x83c   : > { %s1007_s22 = scalar_lea.sflag [#allocation4], %s1006_s23 }
 0x83d   : > { %p1148_p7 = pnand %p1151_p4, %p1422_p6 }
 0x83f   : > { %p1149_p8 = pneg %p1148_p7 }
 0x841   : > { %1276 = dma.done.wait (%p1149_p8), %s1007_s22, 128  }
 0x842   : > { %1278 = vsyncadd (%p1149_p8), %s1007_s22, 4294967168  ;;  %s1606_s29 = sld [smem:[#allocation6_spill]]  ;;  %p23_p9 = scmp.ge.s32.totalorder %s1405_s14, 4  }
 0x843   : > { %s1607_s25 = smov %s1285_s26  ;;  %s1608_s26 = smov %s1289_s27 }
 0x844   : > { %s1610_s28 = smov %s1405_s14  ;;  %25 = sbr.rel (!%p23_p9) target bundleno = 7 (0x7), region = 107 }
 0x848   : > { %s1609_s27 = smov %s1606_s29 }
 0x849   :  { %1013 = vsyncpa [#allocation4], 1 }
 0x84a   :  { %1015 = vsyncpa [#allocation4 + $0x1], 1 }

</bundles_post_ra>
